<compile_context>
chip_gen: v5e
topology: v5e:2x2
jax: 0.10.0
libtpu: 0.0.40
codegen_flags: <defaults>
</compile_context>

<pallas_src>
import functools

import jax
import jax.numpy as jnp
from jax.experimental import pallas as pl
from jax.experimental.pallas import tpu as pltpu

_LANE = 128


def _round_up(v, m):
    return (v + m - 1) // m * m


def _plan_tiling(n):
    """Pick (tile_n, vmem_limit_bytes) from the local TPU's VMEM capacity."""
    try:
        info = pltpu.get_tpu_info()
        vmem_bytes = int(getattr(info, "vmem_capacity_bytes", 64 << 20))
    except Exception:  # not on TPU / query unavailable -> conservative (v7x) floor
        vmem_bytes = 64 << 20
    # VMEM per node per grid step (bytes):
    #   double-buffered slab tile (4 rows padded to 8 sublanes, f32)  ~ 64
    #   one-hot (B padded to 8 sublanes, f32)                         ~ 32
    #   compare / cast temporaries                                    ~ 64
    per_node = 160
    budget = vmem_bytes // 2
    cap = max(_LANE, (budget // per_node) // _LANE * _LANE)
    cap = min(cap, 128 * 1024)              # sanity cap on tile width
    tile_n = min(cap, _round_up(max(n, 1), _LANE))
    vmem_limit = int(min(vmem_bytes * 3 // 4,
                         max(32 << 20, per_node * tile_n * 2)))
    return tile_n, vmem_limit


def _segment_sum_kernel(slab_ref, part_ref):
    # slab_ref: (F_in+2, TILE_N) f32 -- rows [features..., ones, bitcast(batch)]
    # part_ref: (B, F_in+1) f32 output partials for this core-split; the block
    #           index depends only on the leading ("parallel") grid axis, so it
    #           stays resident across the inner ("arbitrary") reduction axis.
    k = pl.program_id(1)

    @pl.when(k == 0)
    def _init():
        part_ref[...] = jnp.zeros_like(part_ref)

    num_graphs = part_ref.shape[0]
    f_ext = part_ref.shape[1]                       # F_in + 1 (ones row fused)

    feats = slab_ref[:f_ext, :]                     # (F_in+1, TILE_N) f32
    batch = pltpu.bitcast(slab_ref[f_ext:f_ext + 1, :], jnp.int32)  # (1, TILE_N)

    # Cheap VPU compare: (B,1) iota against (1,TILE_N) batch row.
    seg = jax.lax.broadcasted_iota(jnp.int32, (num_graphs, 1), 0)
    onehot = (seg == batch).astype(jnp.float32)     # (B, TILE_N)

    # Single MXU pass contracting the lane (N) axis -> [sums | counts].
    part_ref[...] += jax.lax.dot_general(
        onehot, feats, (((1,), (1,)), ((), ())),
        preferred_element_type=jnp.float32)


def _finalize_kernel(part_ref, w1_ref, b1_ref, w2_ref, b2_ref, out_ref):
    # part_ref: (core_splits, B, F_in+1); combine partials, mean, 2-layer MLP.
    total = part_ref[0]
    for c in range(1, part_ref.shape[0]):
        total = total + part_ref[c]
    f_in = w1_ref.shape[0]
    sums = total[:, :f_in]
    counts = total[:, f_in:f_in + 1]
    mean = sums / jnp.maximum(counts, 1.0)
    h = jnp.maximum(
        jnp.dot(mean, w1_ref[...], preferred_element_type=jnp.float32)
        + b1_ref[...], 0.0)
    out_ref[...] = (jnp.dot(h, w2_ref[...], preferred_element_type=jnp.float32)
                    + b2_ref[...]).astype(out_ref.dtype)


@functools.partial(
    jax.jit,
    static_argnames=("num_graphs", "tile_n", "core_splits", "vmem_limit"))
def _global_encoder_impl(x, batch, w1, b1, w2, b2, *, num_graphs, tile_n,
                         core_splits, vmem_limit):
    n, f_in = x.shape
    hidden = w1.shape[1]
    out_dim = w2.shape[1]

    blocks_per_core = max(int(pl.cdiv(n, core_splits * tile_n)), 1)
    n_pad = core_splits * blocks_per_core * tile_n
    pad = n_pad - n

    # Fused feature slab: [x.T ; ones ; bitcast(batch)] with padded columns
    # having zero features and batch id -1 (dropped by the one-hot compare).
    x32 = x.astype(jnp.float32)
    feat = jnp.concatenate([x32.T, jnp.ones((1, n), jnp.float32)], axis=0)
    feat = jnp.pad(feat, ((0, 0), (0, pad)))                    # zero-pad
    bat = jnp.pad(batch.astype(jnp.int32), (0, pad), constant_values=-1)
    bat_f = jax.lax.bitcast_convert_type(bat, jnp.float32)[None, :]
    slab = jnp.concatenate([feat, bat_f], axis=0)               # (F_in+2, n_pad)

    bpc = blocks_per_core  # static closure for the index_map

    partials = pl.pallas_call(
        _segment_sum_kernel,
        out_shape=jax.ShapeDtypeStruct(
            (core_splits, num_graphs, f_in + 1), jnp.float32),
        grid_spec=pltpu.PrefetchScalarGridSpec(
            num_scalar_prefetch=0,
            grid=(core_splits, blocks_per_core),
            in_specs=[
                pl.BlockSpec((f_in + 2, tile_n),
                             lambda c, k: (0, c * bpc + k)),
            ],
            out_specs=pl.BlockSpec((None, num_graphs, f_in + 1),
                                   lambda c, k: (c, 0, 0)),
        ),
        compiler_params=pltpu.CompilerParams(
            dimension_semantics=("parallel", "arbitrary"),
            vmem_limit_bytes=vmem_limit),
        cost_estimate=pl.CostEstimate(
            flops=2 * num_graphs * n_pad * (f_in + 1),
            transcendentals=0,
            bytes_accessed=n_pad * (f_in + 2) * 4
                           + core_splits * num_graphs * (f_in + 1) * 4),
    )(slab)

    w1f = w1.astype(jnp.float32)
    w2f = w2.astype(jnp.float32)
    b1_2d = b1.reshape(1, hidden).astype(jnp.float32)
    b2_2d = b2.reshape(1, out_dim).astype(jnp.float32)

    out = pl.pallas_call(
        _finalize_kernel,
        out_shape=jax.ShapeDtypeStruct((num_graphs, out_dim), jnp.float32),
        grid_spec=pltpu.PrefetchScalarGridSpec(
            num_scalar_prefetch=0,
            grid=(1,),
            in_specs=[
                pl.BlockSpec((core_splits, num_graphs, f_in + 1),
                             lambda i: (0, 0, 0)),
                pl.BlockSpec((f_in, hidden), lambda i: (0, 0)),
                pl.BlockSpec((1, hidden), lambda i: (0, 0)),
                pl.BlockSpec((hidden, out_dim), lambda i: (0, 0)),
                pl.BlockSpec((1, out_dim), lambda i: (0, 0)),
            ],
            out_specs=pl.BlockSpec((num_graphs, out_dim), lambda i: (0, 0)),
        ),
    )(partials, w1f, b1_2d, w2f, b2_2d)
    return out


def global_encoder(x, batch, w1, b1, w2, b2, *, num_graphs, tile_n=None,
                   core_splits=None):
    """scatter_mean(x, batch) -> Lin(2,32) -> ReLU -> Lin(32,32)."""
    n = x.shape[0]
    auto_tile, vmem_limit = _plan_tiling(n)
    if tile_n is None:
        tile_n = auto_tile
    tile_n = _round_up(int(tile_n), _LANE)
    if core_splits is None:
        core_splits = 2 if n > tile_n else 1
    return _global_encoder_impl(
        x, batch, w1, b1, w2, b2, num_graphs=num_graphs, tile_n=tile_n,
        core_splits=int(core_splits), vmem_limit=vmem_limit)


def reference(x, batch, w1, b1, w2, b2, num_graphs):
    # plain-JAX reference for the sanity check
    sums = jax.ops.segment_sum(x, batch, num_segments=num_graphs)
    counts = jax.ops.segment_sum(jnp.ones((x.shape[0],), x.dtype), batch,
                                 num_segments=num_graphs)
    mean = sums / jnp.maximum(counts, 1.0)[:, None]
    h = jnp.maximum(mean @ w1 + b1, 0.0)
    return h @ w2 + b2


if __name__ == "__main__":
    key = jax.random.PRNGKey(0)
    kx, kw1, kb1, kw2, kb2, kx2, kb2b = jax.random.split(key, 7)

    F_IN = 2          # node feature dim (matches Lin(2, 32))
    HIDDEN = 32

    # PyTorch-style uniform(-1/sqrt(fan_in), 1/sqrt(fan_in)) init, deterministic.
    lim1 = 1.0 / jnp.sqrt(jnp.float32(F_IN))
    lim2 = 1.0 / jnp.sqrt(jnp.float32(HIDDEN))
    w1 = jax.random.uniform(kw1, (F_IN, HIDDEN), jnp.float32, -lim1, lim1)
    b1 = jax.random.uniform(kb1, (HIDDEN,), jnp.float32, -lim1, lim1)
    w2 = jax.random.uniform(kw2, (HIDDEN, HIDDEN), jnp.float32, -lim2, lim2)
    b2 = jax.random.uniform(kb2, (HIDDEN,), jnp.float32, -lim2, lim2)

    # --- Test 1: tiny graph batch (single grid step, single core-split) ---
    N1, B1 = 8, 2
    x1 = jax.random.normal(kx, (N1, F_IN), dtype=jnp.float32)
    batch1 = jnp.array([0, 0, 0, 1, 1, 1, 1, 1], dtype=jnp.int32)

    out1 = jax.block_until_ready(
        global_encoder(x1, batch1, w1, b1, w2, b2, num_graphs=B1))
    ref1 = reference(x1, batch1, w1, b1, w2, b2, B1)
    assert out1.shape == (B1, HIDDEN)
    assert jnp.allclose(out1, ref1, atol=1e-5, rtol=1e-5)

    # --- Test 2: larger N, auto tiling ---
    N2, B2 = 1300, 5
    x2 = jax.random.normal(kx2, (N2, F_IN), dtype=jnp.float32)
    batch2 = jax.random.randint(kb2b, (N2,), 0, B2, dtype=jnp.int32)

    out2 = jax.block_until_ready(
        global_encoder(x2, batch2, w1, b1, w2, b2, num_graphs=B2))
    ref2 = reference(x2, batch2, w1, b1, w2, b2, B2)
    assert out2.shape == (B2, HIDDEN)
    assert jnp.allclose(out2, ref2, atol=1e-4, rtol=1e-4)

    # --- Test 3: force small tiles to exercise the dual-core-split +
    #     multi-step accumulation + padding (batch=-1) paths ---
    out3 = jax.block_until_ready(
        global_encoder(x2, batch2, w1, b1, w2, b2, num_graphs=B2, tile_n=256))
    assert jnp.allclose(out3, ref2, atol=1e-4, rtol=1e-4)

    print("KERNEL_OK")
</pallas_src>

<mosaic_0001>
module attributes {stable_mosaic.version = 11 : i64} {
  func.func @_segment_sum_kernel(%arg0: i32, %arg1: i32, %arg2: memref<4x128xf32, #tpu.memory_space<vmem>>, %arg3: memref<1x2x3xf32, #tpu.memory_space<vmem>>) attributes {dimension_semantics = [#tpu.dimension_semantics<parallel>, #tpu.dimension_semantics<arbitrary>], iteration_bounds = array<i64: 1, 1>, scalar_prefetch = 0 : i64, scratch_operands = 0 : i64, tpu.core_type = #tpu.core_type<tc>, window_params = [{transform_indices = @transform_0, window_bounds = array<i64: 4, 128>}, {transform_indices = @transform_1, window_bounds = array<i64: 1, 2, 3>}]} {
    %c0_i32 = arith.constant 0 : i32
    %0 = arith.cmpi eq, %arg1, %c0_i32 : i32
    %1 = arith.extui %0 : i1 to i32
    %c0_i32_0 = arith.constant 0 : i32
    %2 = arith.cmpi ne, %1, %c0_i32_0 : i32
    scf.if %2 {
      %cst_9 = arith.constant 0.000000e+00 : f32
      %19 = vector.broadcast %cst_9 : f32 to vector<2x3xf32>
      %c0_10 = arith.constant 0 : index
      %c0_11 = arith.constant 0 : index
      %c0_12 = arith.constant 0 : index
      %20 = vector.load %arg3[%c0_10, %c0_11, %c0_12] : memref<1x2x3xf32, #tpu.memory_space<vmem>>, vector<1x2x3xf32>
      %21 = vector.shape_cast %20 : vector<1x2x3xf32> to vector<2x3xf32>
      %22 = vector.shape_cast %19 : vector<2x3xf32> to vector<1x2x3xf32>
      tpu.vector_store %arg3[%c0_10, %c0_11, %c0_12], %22 {strides = array<i32>} : memref<1x2x3xf32, #tpu.memory_space<vmem>>, vector<1x2x3xf32>,
    } else {
    }
    %c0 = arith.constant 0 : index
    %c0_1 = arith.constant 0 : index
    %3 = vector.load %arg2[%c0, %c0_1] : memref<4x128xf32, #tpu.memory_space<vmem>>, vector<3x128xf32>
    %c3 = arith.constant 3 : index
    %c0_2 = arith.constant 0 : index
    %4 = vector.load %arg2[%c3, %c0_2] : memref<4x128xf32, #tpu.memory_space<vmem>>, vector<1x128xf32>
    %5 = tpu.bitcast %4 : vector<1x128xf32> -> vector<1x128xi32>
    %6 = tpu.iota {dimensions = array<i32: 0>} : vector<2x1xi32>
    %7 = vector.broadcast %6 : vector<2x1xi32> to vector<2x128xi32>
    %8 = vector.broadcast %5 : vector<1x128xi32> to vector<2x128xi32>
    %9 = arith.cmpi eq, %7, %8 : vector<2x128xi32>
    %10 = arith.extui %9 : vector<2x128xi1> to vector<2x128xi32>
    %11 = arith.sitofp %10 : vector<2x128xi32> to vector<2x128xf32>
    %c0_3 = arith.constant 0 : index
    %c0_4 = arith.constant 0 : index
    %c0_5 = arith.constant 0 : index
    %12 = vector.load %arg3[%c0_3, %c0_4, %c0_5] : memref<1x2x3xf32, #tpu.memory_space<vmem>>, vector<1x2x3xf32>
    %13 = vector.shape_cast %12 : vector<1x2x3xf32> to vector<2x3xf32>
    %cst = arith.constant dense<0.000000e+00> : vector<2x3xf32>
    %14 = tpu.matmul %11, %3, %cst {dimension_numbers = #tpu.dot_dimension_numbers<[1], [1], [0], [0], [0, 0, 1, 0], [], []>} : vector<2x128xf32>, vector<3x128xf32>, vector<2x3xf32> -> vector<2x3xf32>
    %15 = arith.addf %13, %14 : vector<2x3xf32>
    %c0_6 = arith.constant 0 : index
    %c0_7 = arith.constant 0 : index
    %c0_8 = arith.constant 0 : index
    %16 = vector.load %arg3[%c0_6, %c0_7, %c0_8] : memref<1x2x3xf32, #tpu.memory_space<vmem>>, vector<1x2x3xf32>
    %17 = vector.shape_cast %16 : vector<1x2x3xf32> to vector<2x3xf32>
    %18 = vector.shape_cast %15 : vector<2x3xf32> to vector<1x2x3xf32>
    tpu.vector_store %arg3[%c0_6, %c0_7, %c0_8], %18 {strides = array<i32>} : memref<1x2x3xf32, #tpu.memory_space<vmem>>, vector<1x2x3xf32>,
    return
  }
  func.func @transform_0(%arg0: i32, %arg1: i32) -> (i32, i32) {
    %c1_i32 = arith.constant 1 : i32
    %0 = arith.muli %arg0, %c1_i32 : i32
    %1 = arith.addi %0, %arg1 : i32
    %c0_i32 = arith.constant 0 : i32
    %c0_i32_0 = arith.constant 0 : i32
    return %c0_i32, %1 : i32, i32
  }
  func.func @transform_1(%arg0: i32, %arg1: i32) -> (i32, i32, i32) {
    %c0_i32 = arith.constant 0 : i32
    %c0_i32_0 = arith.constant 0 : i32
    %c0_i32_1 = arith.constant 0 : i32
    return %arg0, %c0_i32, %c0_i32_0 : i32, i32, i32
  }
}

module attributes {stable_mosaic.version = 11 : i64} {
  func.func @_finalize_kernel(%arg0: i32, %arg1: memref<1x2x3xf32, #tpu.memory_space<vmem>>, %arg2: memref<2x32xf32, #tpu.memory_space<vmem>>, %arg3: memref<1x32xf32, #tpu.memory_space<vmem>>, %arg4: memref<32x32xf32, #tpu.memory_space<vmem>>, %arg5: memref<1x32xf32, #tpu.memory_space<vmem>>, %arg6: memref<2x32xf32, #tpu.memory_space<vmem>>) attributes {dimension_semantics = [#tpu.dimension_semantics<arbitrary>], iteration_bounds = array<i64: 1>, scalar_prefetch = 0 : i64, scratch_operands = 0 : i64, tpu.core_type = #tpu.core_type<tc>, window_params = [{pipeline_mode = #tpu.pipeline_mode<synchronous>, transform_indices = @transform_0, window_bounds = array<i64: 1, 2, 3>}, {pipeline_mode = #tpu.pipeline_mode<synchronous>, transform_indices = @transform_1, window_bounds = array<i64: 2, 32>}, {pipeline_mode = #tpu.pipeline_mode<synchronous>, transform_indices = @transform_2, window_bounds = array<i64: 1, 32>}, {pipeline_mode = #tpu.pipeline_mode<synchronous>, transform_indices = @transform_3, window_bounds = array<i64: 32, 32>}, {pipeline_mode = #tpu.pipeline_mode<synchronous>, transform_indices = @transform_4, window_bounds = array<i64: 1, 32>}, {pipeline_mode = #tpu.pipeline_mode<synchronous>, transform_indices = @transform_5, window_bounds = array<i64: 2, 32>}]} {
    %c0 = arith.constant 0 : index
    %c0_0 = arith.constant 0 : index
    %c0_1 = arith.constant 0 : index
    %0 = vector.load %arg1[%c0, %c0_0, %c0_1] : memref<1x2x3xf32, #tpu.memory_space<vmem>>, vector<1x2x3xf32>
    %1 = vector.shape_cast %0 : vector<1x2x3xf32> to vector<2x3xf32>
    %2 = vector.extract_strided_slice %1 {offsets = [0, 0], sizes = [2, 2], strides = [1, 1]} : vector<2x3xf32> to vector<2x2xf32>
    %3 = vector.extract_strided_slice %1 {offsets = [0, 2], sizes = [2, 1], strides = [1, 1]} : vector<2x3xf32> to vector<2x1xf32>
    %cst = arith.constant 1.000000e+00 : f32
    %4 = vector.broadcast %cst : f32 to vector<2x1xf32>
    %5 = arith.maximumf %3, %4 : vector<2x1xf32>
    %6 = vector.broadcast %5 : vector<2x1xf32> to vector<2x2xf32>
    %7 = arith.divf %2, %6 : vector<2x2xf32>
    %c0_2 = arith.constant 0 : index
    %c0_3 = arith.constant 0 : index
    %8 = vector.load %arg2[%c0_2, %c0_3] : memref<2x32xf32, #tpu.memory_space<vmem>>, vector<2x32xf32>
    %cst_4 = arith.constant dense<0.000000e+00> : vector<2x32xf32>
    %9 = tpu.matmul %7, %8, %cst_4 {dimension_numbers = #tpu.dot_dimension_numbers<[1], [0], [0], [1], [0, 0, 1, 1], [], []>} : vector<2x2xf32>, vector<2x32xf32>, vector<2x32xf32> -> vector<2x32xf32>
    %c0_5 = arith.constant 0 : index
    %c0_6 = arith.constant 0 : index
    %10 = vector.load %arg3[%c0_5, %c0_6] : memref<1x32xf32, #tpu.memory_space<vmem>>, vector<1x32xf32>
    %11 = vector.broadcast %10 : vector<1x32xf32> to vector<2x32xf32>
    %12 = arith.addf %9, %11 : vector<2x32xf32>
    %cst_7 = arith.constant 0.000000e+00 : f32
    %13 = vector.broadcast %cst_7 : f32 to vector<2x32xf32>
    %14 = arith.maximumf %12, %13 : vector<2x32xf32>
    %c0_8 = arith.constant 0 : index
    %c0_9 = arith.constant 0 : index
    %15 = vector.load %arg4[%c0_8, %c0_9] : memref<32x32xf32, #tpu.memory_space<vmem>>, vector<32x32xf32>
    %cst_10 = arith.constant dense<0.000000e+00> : vector<2x32xf32>
    %16 = tpu.matmul %14, %15, %cst_10 {dimension_numbers = #tpu.dot_dimension_numbers<[1], [0], [0], [1], [0, 0, 1, 1], [], []>} : vector<2x32xf32>, vector<32x32xf32>, vector<2x32xf32> -> vector<2x32xf32>
    %c0_11 = arith.constant 0 : index
    %c0_12 = arith.constant 0 : index
    %17 = vector.load %arg5[%c0_11, %c0_12] : memref<1x32xf32, #tpu.memory_space<vmem>>, vector<1x32xf32>
    %18 = vector.broadcast %17 : vector<1x32xf32> to vector<2x32xf32>
    %19 = arith.addf %16, %18 : vector<2x32xf32>
    %c0_13 = arith.constant 0 : index
    %c0_14 = arith.constant 0 : index
    %20 = vector.load %arg6[%c0_13, %c0_14] : memref<2x32xf32, #tpu.memory_space<vmem>>, vector<2x32xf32>
    tpu.vector_store %arg6[%c0_13, %c0_14], %19 {strides = array<i32>} : memref<2x32xf32, #tpu.memory_space<vmem>>, vector<2x32xf32>,
    return
  }
  func.func @transform_0(%arg0: i32) -> (i32, i32, i32) {
    %c0_i32 = arith.constant 0 : i32
    %c0_i32_0 = arith.constant 0 : i32
    %c0_i32_1 = arith.constant 0 : i32
    %c0_i32_2 = arith.constant 0 : i32
    return %c0_i32, %c0_i32_0, %c0_i32_1 : i32, i32, i32
  }
  func.func @transform_1(%arg0: i32) -> (i32, i32) {
    %c0_i32 = arith.constant 0 : i32
    %c0_i32_0 = arith.constant 0 : i32
    %c0_i32_1 = arith.constant 0 : i32
    return %c0_i32, %c0_i32_0 : i32, i32
  }
  func.func @transform_2(%arg0: i32) -> (i32, i32) {
    %c0_i32 = arith.constant 0 : i32
    %c0_i32_0 = arith.constant 0 : i32
    %c0_i32_1 = arith.constant 0 : i32
    return %c0_i32, %c0_i32_0 : i32, i32
  }
  func.func @transform_3(%arg0: i32) -> (i32, i32) {
    %c0_i32 = arith.constant 0 : i32
    %c0_i32_0 = arith.constant 0 : i32
    %c0_i32_1 = arith.constant 0 : i32
    return %c0_i32, %c0_i32_0 : i32, i32
  }
  func.func @transform_4(%arg0: i32) -> (i32, i32) {
    %c0_i32 = arith.constant 0 : i32
    %c0_i32_0 = arith.constant 0 : i32
    %c0_i32_1 = arith.constant 0 : i32
    return %c0_i32, %c0_i32_0 : i32, i32
  }
  func.func @transform_5(%arg0: i32) -> (i32, i32) {
    %c0_i32 = arith.constant 0 : i32
    %c0_i32_0 = arith.constant 0 : i32
    %c0_i32_1 = arith.constant 0 : i32
    return %c0_i32, %c0_i32_0 : i32, i32
  }
}

</mosaic_0001>

<bundles_post_ra>
// kernel: _global_encoder_impl.2
= control target key start
LH: loop header
LB: loop body
LE: loop exit
PB: predicated region body
PF: predicated region fallthrough
CT: control target
= control target key end

     0   :  { %v34_v0 = vlaneseq  ;;  %vm29_vm0 = vcmask 17408   ;;  %v79_v4 = vmov 0.0   ;;  %v80_v5 = vmov 1.0   ;;  %s106_s0 = inlined_call_operand.vmem [shape: f32[4,128], index: 0, kind: input, shape index: {}]   ;;  %s107_s1 = inlined_call_operand.vmem [shape: f32[1,2,3], index: 1, kind: output, shape index: {}]  }
   0x1   :  { %v31_v1 = vld [vmem:[%s106_s0] sm:$0x7]  ;;  %v78_v2 = vld [vmem:[%s106_s0 + $0x3] ss:$0 sm:$0xff]  ;;  %30 = vst.msk [vmem:[%s107_s1] sm:$0x3] %vm29_vm0, %v79_v4 }
   0x2   :  { %56 = vmatpush.xpose.msra.mxu0 %v31_v1  ;;  %v35_v3 = vshrl.u32 %v34_v0, 7 }
   0x4   :  { %vm37_vm1 = vcmp.eq.s32.totalorder %v35_v3, %v78_v2 }
   0x5   :  { %75 = vmatmul.msk.f32.vlgmr.msra.gmra.mxu0 %vm37_vm1, %v80_v5 }
   0x8   :  { %v40_v6 = vld [vmem:[%s107_s1] sm:$0x3] }
  0x82   :  { %v58_v7 = vpop.f32.mrf.mxu0 }
  0x83   :  { %v61_v8 = vadd.f32 %v58_v7, %v40_v6 }
  0x85   :  { %63 = vst.msk [vmem:[%s107_s1] sm:$0x3] %vm29_vm0, %v61_v8 }

// kernel: _global_encoder_impl.3
= control target key start
LH: loop header
LB: loop body
LE: loop exit
PB: predicated region body
PF: predicated region fallthrough
CT: control target
= control target key end

     0   :  { %10 = vsyncpa [#allocation3], 0  ;;  %s262_s0 = inlined_call_operand.vmem [shape: f32[1,2,3], index: 0, kind: input, shape index: {}]   ;;  %s263_s1 = inlined_call_operand.vmem [shape: f32[2,32], index: 1, kind: input, shape index: {}]   ;;  %s264_s2 = inlined_call_operand.vmem [shape: f32[1,32], index: 2, kind: input, shape index: {}]   ;;  %s265_s3 = inlined_call_operand.hbm [shape: f32[32,32], index: 3, kind: input, shape index: {}]   ;;  %s266_s4 = inlined_call_operand.vmem [shape: f32[1,32], index: 4, kind: input, shape index: {}]   ;;  %s267_s5 = inlined_call_operand.hbm [shape: f32[2,32], index: 5, kind: output, shape index: {}]  }
   0x1   :  { %11 = vsyncpa [#allocation4], 0  ;;  %s22_s20 = sshll.u32 %s265_s3, 4  ;;  %s209_s21 = smov [#allocation2]   ;;  %s23_s20 = int_to_ptr.hbm [resolvable:$true] %s22_s20 }
   0x2   :  { %s24_s22 = sshll.u32 %s209_s21, 4  ;;  %s210_s23 = smov 128   ;;  %s25_s22 = int_to_ptr.vmem [resolvable:$true] %s24_s22 }
   0x3   :  { %s211_s24 = smov 8  }
   0x4   :  { %30 = dma.hbm_to_vmem [thread:$0]  %s23_s20, 512, %s25_s22, [#allocation3], %s210_s23, %s210_s23, %s211_s24  }
   0x5   :  { %205 = dma.done.wait [#allocation3], 512  }
   0x6   :  { %206 = vsyncadd [#allocation3], 4294966784  ;;  %v212_v0 = vmov 2   ;;  %v37_v1 = vld [vmem:[%s262_s0] sm:$0x3]  ;;  %vm68_vm0 = vcmask 1041408  }
   0x7   :  { %152 = vset.pattern.permute.xlu0 %v212_v0  ;;  %v38_v2 = vmax.f32 %v37_v1, 1.0  ;;  %v59_v3 = vld [vmem:[%s263_s1] sm:$0x3]  ;;  %v96_v4 = vld [vmem:[#allocation2 + $0x18] sm:$0xff]  ;;  %vm64_vm5 = vcmask 15360   ;;  %v95_v17 = vld [vmem:[#allocation2 + $0x10] sm:$0xff] }
   0x8   :  { %144 = vmatpush.msk.msra.mxu0 %vm68_vm0, %v59_v3  ;;  %117 = vmatpush.msra.mxu1 %v96_v4  ;;  %v94_v18 = vld [vmem:[#allocation2 + $0x8] sm:$0xff]  ;;  %v93_v19 = vld [vmem:[#allocation2] sm:$0xff]  ;;  %vm101_vm6 = vcmask 261120   ;;  %s213_s30 = smov [#allocation5]   ;;  %s134_s9 = sshll.u32 %s267_s5, 4  ;;  %vm125_vm7 = vcmask 254976   ;;  %s135_s9 = int_to_ptr.hbm [resolvable:$true] %s134_s9 }
   0x9   :  { %41 = vperm.xlu0 %152, %v38_v2   ;;  %v153_v20 = vld [vmem:[%s264_s2] ss:$0 sm:$0xff]  ;;  %s132_s6 = sshll.u32 %s213_s30, 4  ;;  %s133_s6 = int_to_ptr.vmem [resolvable:$true] %s132_s6 }
   0xa   :  { %118 = vmatpush.msra.mxu1 %v95_v17  ;;  %v154_v24 = vld [vmem:[%s266_s4] ss:$0 sm:$0xff] }
   0xc   :  { %119 = vmatpush.msra.mxu1 %v94_v18 }
   0xe   :  { %120 = vmatpush.msra.mxu1 %v93_v19 }
  0x7b   :  { %v42_v5 = vpop.permute.xlu0 %41 }
  0x7c   :  { %155 = vrcp.f32 %v42_v5  ;;  %v55_v9 = vand.u32 2147483648, %v42_v5  ;;  %v53_v11 = vand.u32 2147483647, %v42_v5  ;;  %vm49_vm2 = vweird.f32 %v42_v5 }
  0x7e   :  { %v56_v13 = vor.u32 1.1754944e-38, %v55_v9  ;;  %vm54_vm4 = vcmp.eq.f32.partialorder %v53_v11, 8.507059e+37 }
  0x82   :  { %v156_v6 = vpop.eup %155 }
  0x83   :  { %v45_v7 = vmul.f32 %v156_v6, %v42_v5  ;;  %vm50_vm1 = vweird.f32 %v156_v6 }
  0x84   :  { %vm51_vm3 = vmor %vm49_vm2, %vm50_vm1 }
  0x85   :  { %v46_v8 = vsub.f32 1.0, %v45_v7 }
  0x87   :  { %v47_v10 = vmul.f32 %v156_v6, %v46_v8 }
  0x89   :  { %v48_v12 = vadd.f32 %v156_v6, %v47_v10 }
  0x8b   :  { %v52_v14 = vsel %vm51_vm3, %v156_v6, %v48_v12 }
  0x8c   :  { %v57_v15 = vsel %vm54_vm4, %v56_v13, %v52_v14 }
  0x8d   :  { %v58_v16 = vmul.f32 %v57_v15, %v37_v1 }
  0x8f   :  { %145 = vmatmul.msk.f32.vlgmr.msra.gmra.mxu0 %vm64_vm5, %v58_v16 }
 0x10c   :  { %v89_v21 = vpop.f32.mrf.mxu0 }
 0x10d   :  { %v90_v22 = vadd.f32 %v153_v20, %v89_v21 }
 0x10f   :  { %v92_v23 = vmax.f32 %v90_v22, 0.0 }
 0x111   :  { %146 = vmatmul.msk.f32.vlgmr.msra.gmra.mxu1 %vm101_vm6, %v92_v23 }
 0x18e   :  { %v122_v25 = vpop.f32.mrf.mxu1 }
 0x18f   :  { %v123_v26 = vadd.f32 %v154_v24, %v122_v25 }
 0x191   :  { %126 = vst.msk [vmem:[#allocation5] sm:$0x3] %vm125_vm7, %v123_v26 }
 0x192   :  { %137 = dma.vmem_to_hbm [thread:$0]  %s133_s6, 32, %s135_s9, [#allocation4]  }
 0x193   :  { %207 = dma.done.wait [#allocation4], 32  }
 0x194   :  { %208 = vsyncadd [#allocation4], 4294967264 }
 0x195   :  { %142 = vsyncpa [#allocation3], 1 }
 0x196   :  { %143 = vsyncpa [#allocation4], 1 }

</bundles_post_ra>
